<compile_context>
chip_gen: v7x
topology: tpu7x:2x2x1
jax: 0.10.0
libtpu: 0.0.40
codegen_flags: <defaults>
</compile_context>

<pallas_src>
import functools

import jax
import jax.numpy as jnp
import numpy as np
from jax.experimental import pallas as pl
from jax.experimental.pallas import tpu as pltpu


def _round_up(x, m):
    return ((x + m - 1) // m) * m


# ---------------------------------------------------------------------------
# Kernel
# ---------------------------------------------------------------------------
def actor_critic_kernel(
    obs_ref,                 # (TB, obs_dim)
    w1_ref, b1_ref,          # shared layer 1: obs_dim -> hidden
    w2_ref, b2_ref,          # shared layer 2: hidden  -> hidden
    wh1_ref, bh1_ref,        # fused actor_l1 | critic_l1: hidden -> hidden
    wh2_ref, bh2_ref,        # fused actor_l2 (lanes 0..A-1) + critic_l2 (lane A)
    out_ref,                 # (TB, out_w) packed (mean | value) slab, out_w small
    *, action_dim,
):
    x = obs_ref[...]

    # shared trunk: Linear -> ReLU -> Linear -> ReLU
    h = jnp.dot(x, w1_ref[...], preferred_element_type=jnp.float32) + b1_ref[...]
    h = jnp.maximum(h, 0.0)
    h = jnp.dot(h, w2_ref[...], preferred_element_type=jnp.float32) + b2_ref[...]
    h = jnp.maximum(h, 0.0)

    # fused first head layer (actor half | critic half), both have ReLU
    h1 = jnp.dot(h, wh1_ref[...], preferred_element_type=jnp.float32) + bh1_ref[...]
    h1 = jnp.maximum(h1, 0.0)

    # fused second head layer into one narrow (mean | value) result
    out = jnp.dot(h1, wh2_ref[...], preferred_element_type=jnp.float32) + bh2_ref[...]

    # sigmoid only on the actor-mean lanes; critic value lane stays linear
    lane = jax.lax.broadcasted_iota(jnp.int32, out.shape, 1)
    out_ref[...] = jnp.where(lane < action_dim, jax.nn.sigmoid(out), out)


# ---------------------------------------------------------------------------
# Parameter packing (do this ONCE, not per forward call)
# ---------------------------------------------------------------------------
def pack_params(params):
    """Fuse the actor/critic head weights into the kernel's packed layout."""
    obs_dim, hidden = params["w1"].shape
    assert hidden % 2 == 0, "head fusion assumes an even hidden_dim"
    half = hidden // 2
    action_dim = params["wa2"].shape[1]
    out_w = max(8, _round_up(action_dim + 1, 8))   # mean lanes + 1 value lane, /8

    # actor_l1 | critic_l1 -> one [hidden, hidden] matmul
    wh1 = jnp.concatenate([params["wa1"], params["wc1"]], axis=1)
    bh1 = jnp.concatenate([params["ba1"], params["bc1"]], axis=1)

    # actor_l2 (lanes 0..A-1) + critic_l2 (lane A) -> one [hidden, out_w] matmul
    wh2 = jnp.zeros((hidden, out_w), jnp.float32)
    wh2 = wh2.at[:half, :action_dim].set(params["wa2"])
    wh2 = wh2.at[half:, action_dim:action_dim + 1].set(params["wc2"])
    bh2 = jnp.zeros((1, out_w), jnp.float32)
    bh2 = bh2.at[:, :action_dim].set(params["ba2"])
    bh2 = bh2.at[:, action_dim:action_dim + 1].set(params["bc2"])

    return dict(
        w1=params["w1"], b1=params["b1"],
        w2=params["w2"], b2=params["b2"],
        wh1=wh1, bh1=bh1, wh2=wh2, bh2=bh2,
        log_std=params["log_std"],
        obs_dim=obs_dim, hidden=hidden, action_dim=action_dim, out_w=out_w,
    )


def _dimension_semantics(num_tiles):
    """CORE_PARALLEL on v7x (2 TCs per chip), plain 'parallel' elsewhere."""
    kind = ""
    try:
        kind = jax.devices()[0].device_kind.lower()
    except Exception:
        pass
    if "v7" in kind and num_tiles >= 2:
        return (pltpu.CORE_PARALLEL,)
    return ("parallel",)


# ---------------------------------------------------------------------------
# Forward wrapper
# ---------------------------------------------------------------------------
def actor_critic_forward(obs, packed, *, max_batch_tile=2048, vmem_limit_bytes=None):
    B, obs_dim = obs.shape
    assert obs_dim == packed["obs_dim"]
    action_dim = packed["action_dim"]
    out_w = packed["out_w"]

    # batch tiling: TB multiple of 8 sublanes, pad B up to a tile multiple
    tb = min(max_batch_tile, _round_up(B, 8))
    b_pad = _round_up(B, tb)
    obs_p = obs if b_pad == B else jnp.pad(obs, ((0, b_pad - B), (0, 0)))
    num_tiles = b_pad // tb

    def stationary(shape):
        # whole weight resident in VMEM; constant index_map -> fetched once,
        # Buffered(1) avoids allocating a useless second buffer.
        return pl.BlockSpec(shape, lambda i: (0, 0), pipeline_mode=pl.Buffered(1))

    compiler_kwargs = dict(dimension_semantics=_dimension_semantics(num_tiles))
    if vmem_limit_bytes is not None:
        compiler_kwargs["vmem_limit_bytes"] = vmem_limit_bytes

    slab = pl.pallas_call(
        functools.partial(actor_critic_kernel, action_dim=action_dim),
        out_shape=jax.ShapeDtypeStruct((b_pad, out_w), jnp.float32),
        grid=(num_tiles,),
        in_specs=[
            pl.BlockSpec((tb, obs_dim), lambda i: (i, 0)),
            stationary(packed["w1"].shape), stationary(packed["b1"].shape),
            stationary(packed["w2"].shape), stationary(packed["b2"].shape),
            stationary(packed["wh1"].shape), stationary(packed["bh1"].shape),
            stationary(packed["wh2"].shape), stationary(packed["bh2"].shape),
        ],
        out_specs=pl.BlockSpec((tb, out_w), lambda i: (i, 0)),
        compiler_params=pltpu.CompilerParams(**compiler_kwargs),
    )(obs_p, packed["w1"], packed["b1"], packed["w2"], packed["b2"],
      packed["wh1"], packed["bh1"], packed["wh2"], packed["bh2"])

    mean = slab[:B, :action_dim]
    value = slab[:B, action_dim:action_dim + 1]
    # batch-independent: compute in the wrapper, not in the kernel
    std = jnp.exp(packed["log_std"][0])
    return mean, std, value


# ---------------------------------------------------------------------------
# Synthetic params + pure-JAX reference
# ---------------------------------------------------------------------------
def make_params(key, obs_dim, hidden_dim, action_dim):
    """Deterministic synthetic parameter init (PyTorch-style uniform fan-in)."""
    keys = jax.random.split(key, 12)

    def linear(kw, kb, fan_in, fan_out):
        bound = 1.0 / np.sqrt(fan_in)
        w = jax.random.uniform(kw, (fan_in, fan_out), jnp.float32, -bound, bound)
        b = jax.random.uniform(kb, (1, fan_out), jnp.float32, -bound, bound)
        return w, b

    half = hidden_dim // 2
    w1, b1 = linear(keys[0], keys[1], obs_dim, hidden_dim)
    w2, b2 = linear(keys[2], keys[3], hidden_dim, hidden_dim)
    wa1, ba1 = linear(keys[4], keys[5], hidden_dim, half)
    wa2, ba2 = linear(keys[6], keys[7], half, action_dim)
    wc1, bc1 = linear(keys[8], keys[9], hidden_dim, half)
    wc2, bc2 = linear(keys[10], keys[11], half, 1)
    log_std = jnp.zeros((1, action_dim), jnp.float32)  # nn.Parameter(torch.zeros(action_dim))

    return dict(
        w1=w1, b1=b1, w2=w2, b2=b2,
        wa1=wa1, ba1=ba1, wa2=wa2, ba2=ba2,
        log_std=log_std,
        wc1=wc1, bc1=bc1, wc2=wc2, bc2=bc2,
    )


def reference_forward(obs, p):
    """Pure-JAX reference matching the PyTorch forward."""
    h = jnp.maximum(obs @ p["w1"] + p["b1"], 0.0)
    h = jnp.maximum(h @ p["w2"] + p["b2"], 0.0)
    a = jnp.maximum(h @ p["wa1"] + p["ba1"], 0.0)
    mean = jax.nn.sigmoid(a @ p["wa2"] + p["ba2"])
    std = jnp.exp(p["log_std"][0])
    c = jnp.maximum(h @ p["wc1"] + p["bc1"], 0.0)
    value = c @ p["wc2"] + p["bc2"]
    return mean, std, value


if __name__ == "__main__":
    obs_dim, action_dim, hidden_dim = 16, 4, 32
    batch = 10  # not a multiple of 8 -> exercises the batch-padding path

    key = jax.random.PRNGKey(0)
    k_obs, k_params = jax.random.split(key)

    obs = jax.random.normal(k_obs, (batch, obs_dim), dtype=jnp.float32)
    params = make_params(k_params, obs_dim, hidden_dim, action_dim)
    packed = pack_params(params)  # pack fused head weights once, reuse every call

    mean, std, value = actor_critic_forward(obs, packed)
    jax.block_until_ready((mean, std, value))

    mean_ref, std_ref, value_ref = reference_forward(obs, params)
    np.testing.assert_allclose(np.asarray(mean), np.asarray(mean_ref), rtol=1e-5, atol=1e-5)
    np.testing.assert_allclose(np.asarray(std), np.asarray(std_ref), rtol=1e-5, atol=1e-5)
    np.testing.assert_allclose(np.asarray(value), np.asarray(value_ref), rtol=1e-5, atol=1e-5)

    assert mean.shape == (batch, action_dim)
    assert std.shape == (action_dim,)
    assert value.shape == (batch, 1)

    print("KERNEL_OK")
</pallas_src>

<mosaic_0001>
module attributes {stable_mosaic.version = 11 : i64} {
  func.func @actor_critic_kernel(%arg0: i32, %arg1: memref<16x16xf32, #tpu.memory_space<vmem>>, %arg2: memref<16x32xf32, #tpu.memory_space<vmem>>, %arg3: memref<1x32xf32, #tpu.memory_space<vmem>>, %arg4: memref<32x32xf32, #tpu.memory_space<vmem>>, %arg5: memref<1x32xf32, #tpu.memory_space<vmem>>, %arg6: memref<32x32xf32, #tpu.memory_space<vmem>>, %arg7: memref<1x32xf32, #tpu.memory_space<vmem>>, %arg8: memref<32x8xf32, #tpu.memory_space<vmem>>, %arg9: memref<1x8xf32, #tpu.memory_space<vmem>>, %arg10: memref<16x8xf32, #tpu.memory_space<vmem>>) attributes {dimension_semantics = [#tpu.dimension_semantics<parallel>], iteration_bounds = array<i64: 1>, scalar_prefetch = 0 : i64, scratch_operands = 0 : i64, tpu.core_type = #tpu.core_type<tc>, window_params = [{transform_indices = @transform_0, window_bounds = array<i64: 16, 16>}, {pipeline_mode = #tpu.pipeline_mode<synchronous>, transform_indices = @transform_1, window_bounds = array<i64: 16, 32>}, {pipeline_mode = #tpu.pipeline_mode<synchronous>, transform_indices = @transform_2, window_bounds = array<i64: 1, 32>}, {pipeline_mode = #tpu.pipeline_mode<synchronous>, transform_indices = @transform_3, window_bounds = array<i64: 32, 32>}, {pipeline_mode = #tpu.pipeline_mode<synchronous>, transform_indices = @transform_4, window_bounds = array<i64: 1, 32>}, {pipeline_mode = #tpu.pipeline_mode<synchronous>, transform_indices = @transform_5, window_bounds = array<i64: 32, 32>}, {pipeline_mode = #tpu.pipeline_mode<synchronous>, transform_indices = @transform_6, window_bounds = array<i64: 1, 32>}, {pipeline_mode = #tpu.pipeline_mode<synchronous>, transform_indices = @transform_7, window_bounds = array<i64: 32, 8>}, {pipeline_mode = #tpu.pipeline_mode<synchronous>, transform_indices = @transform_8, window_bounds = array<i64: 1, 8>}, {transform_indices = @transform_9, window_bounds = array<i64: 16, 8>}]} {
    %c0 = arith.constant 0 : index
    %c0_0 = arith.constant 0 : index
    %0 = vector.load %arg1[%c0, %c0_0] : memref<16x16xf32, #tpu.memory_space<vmem>>, vector<16x16xf32>
    %c0_1 = arith.constant 0 : index
    %c0_2 = arith.constant 0 : index
    %1 = vector.load %arg2[%c0_1, %c0_2] : memref<16x32xf32, #tpu.memory_space<vmem>>, vector<16x32xf32>
    %cst = arith.constant dense<0.000000e+00> : vector<16x32xf32>
    %2 = tpu.matmul %0, %1, %cst {dimension_numbers = #tpu.dot_dimension_numbers<[1], [0], [0], [1], [0, 0, 1, 1], [], []>} : vector<16x16xf32>, vector<16x32xf32>, vector<16x32xf32> -> vector<16x32xf32>
    %c0_3 = arith.constant 0 : index
    %c0_4 = arith.constant 0 : index
    %3 = vector.load %arg3[%c0_3, %c0_4] : memref<1x32xf32, #tpu.memory_space<vmem>>, vector<1x32xf32>
    %4 = vector.broadcast %3 : vector<1x32xf32> to vector<16x32xf32>
    %5 = arith.addf %2, %4 : vector<16x32xf32>
    %cst_5 = arith.constant 0.000000e+00 : f32
    %6 = vector.broadcast %cst_5 : f32 to vector<16x32xf32>
    %7 = arith.maximumf %5, %6 : vector<16x32xf32>
    %c0_6 = arith.constant 0 : index
    %c0_7 = arith.constant 0 : index
    %8 = vector.load %arg4[%c0_6, %c0_7] : memref<32x32xf32, #tpu.memory_space<vmem>>, vector<32x32xf32>
    %cst_8 = arith.constant dense<0.000000e+00> : vector<16x32xf32>
    %9 = tpu.matmul %7, %8, %cst_8 {dimension_numbers = #tpu.dot_dimension_numbers<[1], [0], [0], [1], [0, 0, 1, 1], [], []>} : vector<16x32xf32>, vector<32x32xf32>, vector<16x32xf32> -> vector<16x32xf32>
    %c0_9 = arith.constant 0 : index
    %c0_10 = arith.constant 0 : index
    %10 = vector.load %arg5[%c0_9, %c0_10] : memref<1x32xf32, #tpu.memory_space<vmem>>, vector<1x32xf32>
    %11 = vector.broadcast %10 : vector<1x32xf32> to vector<16x32xf32>
    %12 = arith.addf %9, %11 : vector<16x32xf32>
    %cst_11 = arith.constant 0.000000e+00 : f32
    %13 = vector.broadcast %cst_11 : f32 to vector<16x32xf32>
    %14 = arith.maximumf %12, %13 : vector<16x32xf32>
    %c0_12 = arith.constant 0 : index
    %c0_13 = arith.constant 0 : index
    %15 = vector.load %arg6[%c0_12, %c0_13] : memref<32x32xf32, #tpu.memory_space<vmem>>, vector<32x32xf32>
    %cst_14 = arith.constant dense<0.000000e+00> : vector<16x32xf32>
    %16 = tpu.matmul %14, %15, %cst_14 {dimension_numbers = #tpu.dot_dimension_numbers<[1], [0], [0], [1], [0, 0, 1, 1], [], []>} : vector<16x32xf32>, vector<32x32xf32>, vector<16x32xf32> -> vector<16x32xf32>
    %c0_15 = arith.constant 0 : index
    %c0_16 = arith.constant 0 : index
    %17 = vector.load %arg7[%c0_15, %c0_16] : memref<1x32xf32, #tpu.memory_space<vmem>>, vector<1x32xf32>
    %18 = vector.broadcast %17 : vector<1x32xf32> to vector<16x32xf32>
    %19 = arith.addf %16, %18 : vector<16x32xf32>
    %cst_17 = arith.constant 0.000000e+00 : f32
    %20 = vector.broadcast %cst_17 : f32 to vector<16x32xf32>
    %21 = arith.maximumf %19, %20 : vector<16x32xf32>
    %c0_18 = arith.constant 0 : index
    %c0_19 = arith.constant 0 : index
    %22 = vector.load %arg8[%c0_18, %c0_19] : memref<32x8xf32, #tpu.memory_space<vmem>>, vector<32x8xf32>
    %cst_20 = arith.constant dense<0.000000e+00> : vector<16x8xf32>
    %23 = tpu.matmul %21, %22, %cst_20 {dimension_numbers = #tpu.dot_dimension_numbers<[1], [0], [0], [1], [0, 0, 1, 1], [], []>} : vector<16x32xf32>, vector<32x8xf32>, vector<16x8xf32> -> vector<16x8xf32>
    %c0_21 = arith.constant 0 : index
    %c0_22 = arith.constant 0 : index
    %24 = vector.load %arg9[%c0_21, %c0_22] : memref<1x8xf32, #tpu.memory_space<vmem>>, vector<1x8xf32>
    %25 = vector.broadcast %24 : vector<1x8xf32> to vector<16x8xf32>
    %26 = arith.addf %23, %25 : vector<16x8xf32>
    %27 = tpu.iota {dimensions = array<i32: 1>} : vector<16x8xi32>
    %c4_i32 = arith.constant 4 : i32
    %28 = vector.broadcast %c4_i32 : i32 to vector<16x8xi32>
    %29 = arith.cmpi slt, %27, %28 : vector<16x8xi32>
    %30 = arith.negf %26 : vector<16x8xf32>
    %31 = math.exp %30 : vector<16x8xf32>
    %cst_23 = arith.constant 1.000000e+00 : f32
    %32 = vector.broadcast %cst_23 : f32 to vector<16x8xf32>
    %33 = arith.addf %32, %31 : vector<16x8xf32>
    %34 = arith.divf %32, %33 : vector<16x8xf32>
    %35 = arith.select %29, %34, %26 : vector<16x8xi1>, vector<16x8xf32>
    %c0_24 = arith.constant 0 : index
    %c0_25 = arith.constant 0 : index
    %36 = vector.load %arg10[%c0_24, %c0_25] : memref<16x8xf32, #tpu.memory_space<vmem>>, vector<16x8xf32>
    tpu.vector_store %arg10[%c0_24, %c0_25], %35 {strides = array<i32>} : memref<16x8xf32, #tpu.memory_space<vmem>>, vector<16x8xf32>,
    return
  }
  func.func @transform_0(%arg0: i32) -> (i32, i32) {
    %c0_i32 = arith.constant 0 : i32
    %c0_i32_0 = arith.constant 0 : i32
    return %arg0, %c0_i32 : i32, i32
  }
  func.func @transform_1(%arg0: i32) -> (i32, i32) {
    %c0_i32 = arith.constant 0 : i32
    %c0_i32_0 = arith.constant 0 : i32
    %c0_i32_1 = arith.constant 0 : i32
    return %c0_i32, %c0_i32_0 : i32, i32
  }
  func.func @transform_2(%arg0: i32) -> (i32, i32) {
    %c0_i32 = arith.constant 0 : i32
    %c0_i32_0 = arith.constant 0 : i32
    %c0_i32_1 = arith.constant 0 : i32
    return %c0_i32, %c0_i32_0 : i32, i32
  }
  func.func @transform_3(%arg0: i32) -> (i32, i32) {
    %c0_i32 = arith.constant 0 : i32
    %c0_i32_0 = arith.constant 0 : i32
    %c0_i32_1 = arith.constant 0 : i32
    return %c0_i32, %c0_i32_0 : i32, i32
  }
  func.func @transform_4(%arg0: i32) -> (i32, i32) {
    %c0_i32 = arith.constant 0 : i32
    %c0_i32_0 = arith.constant 0 : i32
    %c0_i32_1 = arith.constant 0 : i32
    return %c0_i32, %c0_i32_0 : i32, i32
  }
  func.func @transform_5(%arg0: i32) -> (i32, i32) {
    %c0_i32 = arith.constant 0 : i32
    %c0_i32_0 = arith.constant 0 : i32
    %c0_i32_1 = arith.constant 0 : i32
    return %c0_i32, %c0_i32_0 : i32, i32
  }
  func.func @transform_6(%arg0: i32) -> (i32, i32) {
    %c0_i32 = arith.constant 0 : i32
    %c0_i32_0 = arith.constant 0 : i32
    %c0_i32_1 = arith.constant 0 : i32
    return %c0_i32, %c0_i32_0 : i32, i32
  }
  func.func @transform_7(%arg0: i32) -> (i32, i32) {
    %c0_i32 = arith.constant 0 : i32
    %c0_i32_0 = arith.constant 0 : i32
    %c0_i32_1 = arith.constant 0 : i32
    return %c0_i32, %c0_i32_0 : i32, i32
  }
  func.func @transform_8(%arg0: i32) -> (i32, i32) {
    %c0_i32 = arith.constant 0 : i32
    %c0_i32_0 = arith.constant 0 : i32
    %c0_i32_1 = arith.constant 0 : i32
    return %c0_i32, %c0_i32_0 : i32, i32
  }
  func.func @transform_9(%arg0: i32) -> (i32, i32) {
    %c0_i32 = arith.constant 0 : i32
    %c0_i32_0 = arith.constant 0 : i32
    return %arg0, %c0_i32 : i32, i32
  }
}

</mosaic_0001>

<bundles_post_ra>
// kernel: tpu_custom_call.1
= control target key start
LH: loop header
LB: loop body
LE: loop exit
PB: predicated region body
PF: predicated region fallthrough
CT: control target
= control target key end

     0   :  { %14 = vsyncpa [#allocation3], 0  ;;  %s758_s0 = inlined_call_operand.vmem [shape: f32[16,16], index: 0, kind: input, shape index: {}]   ;;  %s759_s1 = inlined_call_operand.hbm [shape: f32[16,32], index: 1, kind: input, shape index: {}]   ;;  %s760_s2 = inlined_call_operand.vmem [shape: f32[1,32], index: 2, kind: input, shape index: {}]   ;;  %s761_s3 = inlined_call_operand.vmem [shape: f32[32,32], index: 3, kind: input, shape index: {}]   ;;  %s762_s4 = inlined_call_operand.vmem [shape: f32[1,32], index: 4, kind: input, shape index: {}]   ;;  %s763_s5 = inlined_call_operand.hbm [shape: f32[32,32], index: 5, kind: input, shape index: {}]   ;;  %s764_s6 = inlined_call_operand.vmem [shape: f32[1,32], index: 6, kind: input, shape index: {}]   ;;  %s765_s7 = inlined_call_operand.vmem [shape: f32[32,8], index: 7, kind: input, shape index: {}]   ;;  %s766_s8 = inlined_call_operand.vmem [shape: f32[1,8], index: 8, kind: input, shape index: {}]   ;;  %s767_s9 = inlined_call_operand.vmem [shape: f32[16,8], index: 9, kind: output, shape index: {}]  }
   0x1   :  { %15 = vsyncpa [#allocation5], 0  ;;  %s626_s30 = smov [#allocation2]   ;;  %s578_s13 = scalar_lea.hbm %s759_s1, 256 }
   0x2   :  { %s23_s10 = sshll.u32 %s626_s30, 4  ;;  %p579_p0 = scmp.ne.s32.totalorder %s759_s1, %s578_s13  ;;  %s24_s10 = int_to_ptr.vmem [resolvable:$true] %s23_s10 }
   0x3   :  { %p582_p1 = scmp.lt.u32.totalorder %s578_s13, %s759_s1 }
   0x5   :  { %p584_p2 = pnand %p582_p1, %p579_p0 }
   0x7   :  { %587 = shalt.err (!%p584_p2)
}
   0x8   :  { %s588_s18 = scalar_lea.vmem %s24_s10, 256  ;;  %p593_p4 = scmp.lt.s32.totalorder %s24_s10, %s24_s10 }
   0x9   :  { %p589_p3 = scmp.ne.s32.totalorder %s24_s10, %s588_s18  ;;  %p594_p5 = scmp.lt.s32.totalorder %s588_s18, %s588_s18 }
   0xb   :  { %p595_p6 = por %p594_p5, %p593_p4 }
   0xd   :  { %p596_p7 = pnand %p595_p6, %p589_p3 }
   0xf   :  { %599 = shalt.err (!%p596_p7)
}
  0x10   :  { %s627_s19 = smov 128   ;;  %s628_s20 = smov 8  }
  0x11   :  { %29 = dma.hbm_to_vmem [thread:$0]  %s759_s1, 256, %s24_s10, [#allocation3], %s627_s19, %s627_s19, %s628_s20  }
  0x12   :  { %s629_s23 = smov [#allocation4]   ;;  %s600_s27 = scalar_lea.hbm %s763_s5, 512 }
  0x13   :  { %s41_s24 = sshll.u32 %s629_s23, 4  ;;  %p601_p8 = scmp.ne.s32.totalorder %s763_s5, %s600_s27  ;;  %s42_s24 = int_to_ptr.vmem [resolvable:$true] %s41_s24 }
  0x14   :  { %p604_p9 = scmp.lt.u32.totalorder %s600_s27, %s763_s5 }
  0x16   :  { %p606_p10 = pnand %p604_p9, %p601_p8 }
  0x18   :  { %609 = shalt.err (!%p606_p10)
}
  0x19   :  { %s610_s12 = scalar_lea.vmem %s42_s24, 512  ;;  %p615_p12 = scmp.lt.s32.totalorder %s42_s24, %s42_s24 }
  0x1a   :  { %p611_p11 = scmp.ne.s32.totalorder %s42_s24, %s610_s12  ;;  %p616_p13 = scmp.lt.s32.totalorder %s610_s12, %s610_s12 }
  0x1c   :  { %p617_p0 = por %p616_p13, %p615_p12 }
  0x1e   :  { %p618_p1 = pnand %p617_p0, %p611_p11 }
  0x20   :  { %621 = shalt.err (!%p618_p1)
}
  0x21   :  { %47 = dma.hbm_to_vmem [thread:$0]  %s763_s5, 512, %s42_s24, [#allocation5], %s627_s19, %s627_s19, %s628_s20  }
  0x22   :  { %622 = dma.done.wait [#allocation3], 256  }
  0x23   :  { %623 = vsyncadd [#allocation3], 4294967040 }
  0x24   :  { %624 = dma.done.wait [#allocation5], 512  }
  0x25   :  { %625 = vsyncadd [#allocation5], 4294966784  ;;  %vm71_vm0 = vcmask 130048   ;;  %v62_v0 = vld [vmem:[#allocation2] sm:$0xff]  ;;  %v63_v1 = vld [vmem:[#allocation2 + $0x8] sm:$0xff]  ;;  %vm166_vm1 = vcmask 261120   ;;  %v436_v55 = vlaneseq }
  0x26   :  { %v60_v2 = vld [vmem:[%s758_s0] sm:$0xff]  ;;  %v538_v3 = vpack.c.bf16 %v63_v1, %v62_v0  ;;  %v156_v5 = vld [vmem:[%s761_s3 + $0x8] sm:$0xff]  ;;  %v157_v8 = vld [vmem:[%s761_s3 + $0x10] sm:$0xff]  ;;  %vm453_vm3 = vcmask 64512  }
  0x27   :  { %502 = vmatprep.mubr.msk.f32.mxu0 %vm71_vm0, %v60_v2  ;;  %v155_v4 = vld [vmem:[%s761_s3] sm:$0xff]  ;;  %v61_v7 = vld [vmem:[%s758_s0 + $0x8] sm:$0xff]  ;;  %v158_v9 = vld [vmem:[%s761_s3 + $0x18] sm:$0xff]  ;;  %v437_v56 = vand.u32 127, %v436_v55 }
  0x28   :  { %v542_v6 = vpack.c.bf16 %v156_v5, %v155_v4  ;;  %539 = vmatprep.subr.bf16.mxu0 %v538_v3  ;;  %v546_v10 = vpack.c.bf16 %v158_v9, %v157_v8  ;;  %v250_v11 = vld [vmem:[#allocation4] sm:$0xff]  ;;  %v251_v12 = vld [vmem:[#allocation4 + $0x8] sm:$0xff]  ;;  %v462_v14 = vld [vmem:[%s760_s2] ss:$0 sm:$0xff] }
  0x29   :  { %541 = vmatpush3.bf16.msra.mxu0 %v538_v3  ;;  %v550_v13 = vpack.c.bf16 %v251_v12, %v250_v11  ;;  %v252_v21 = vld [vmem:[#allocation4 + $0x10] sm:$0xff]  ;;  %v253_v22 = vld [vmem:[#allocation4 + $0x18] sm:$0xff]  ;;  %v346_v34 = vld [vmem:[%s765_s7 + $0x10] sm:$0xff]  ;;  %vm438_vm2 = vcmp.lt.s32.totalorder %v437_v56, 4 }
  0x2a   :  { %543 = vmatprep.subr.bf16.mxu1 %v542_v6  ;;  %v554_v23 = vpack.c.bf16 %v253_v22, %v252_v21  ;;  %v344_v24 = vld [vmem:[%s765_s7] sm:$0xff]  ;;  %v345_v25 = vld [vmem:[%s765_s7 + $0x8] sm:$0xff]  ;;  %v347_v35 = vld [vmem:[%s765_s7 + $0x18] sm:$0xff] }
  0x2b   :  { %545 = vmatpush3.bf16.msra.mxu1 %v542_v6  ;;  %551 = vmatprep.subr.bf16.mxu0 %v550_v13  ;;  %v558_v26 = vpack.c.bf16 %v345_v25, %v344_v24  ;;  %v465_v27 = vld [vmem:[%s762_s4] ss:$0 sm:$0xff]  ;;  %v562_v36 = vpack.c.bf16 %v347_v35, %v346_v34 }
  0x2c   :  { %503 = vmatmul.mubr.msk.f32.vlgmr.msra.gmra.mrb[0].mxu0 %vm71_vm0, %v61_v7  ;;  %547 = vmatprep.subr.bf16.mxu1 %v546_v10  ;;  %v468_v37 = vld [vmem:[%s764_s6] ss:$0 sm:$0xff] }
  0x2d   :  { %553 = vmatpush3.bf16.msra.mxu0 %v550_v13  ;;  %v471_v44 = vld [vmem:[%s766_s8] ss:$0 sm:$0xff] }
  0x2e   :  { %555 = vmatprep.subr.bf16.mxu0 %v554_v23 }
  0x2f   :  { %549 = vmatpush3.bf16.msra.mxu1 %v546_v10 }
  0x30   :  { %559 = vmatprep.subr.bf16.mxu1 %v558_v26 }
  0x31   :  { %557 = vmatpush3.bf16.msra.mxu0 %v554_v23 }
  0xff   :  { %v504_v15 = vpop.f32.mrb[0].mxu0 }
 0x100   :  { %v150_v16 = vadd.f32 %v504_v15, %v462_v14  ;;  %v144_v17 = vpop.f32.mrb[1].mxu0 }
 0x101   :  { %v145_v18 = vadd.f32 %v462_v14, %v144_v17 }
 0x102   :  { %v154_v20 = vmax.f32 %v150_v16, 0.0 }
 0x103   :  { %v153_v19 = vmax.f32 %v145_v18, 0.0 }
 0x105   :  { %513 = vmatprep.mubr.msk.f32.mxu1 %vm166_vm1, %v153_v19 }
 0x106   :  { %514 = vmatmul.mubr.msk.f32.vlgmr.msra.gmra.mrb[0].mxu1 %vm166_vm1, %v154_v20 }
 0x107   :  { %561 = vmatpush3.bf16.msra.mxu1 %v558_v26 }
 0x108   :  { %563 = vmatprep.subr.bf16.mxu1 %v562_v36 }
 0x10b   :  { %565 = vmatpush3.bf16.msra.mxu1 %v562_v36 }
 0x1d9   :  { %v515_v28 = vpop.f32.mrb[0].mxu1 }
 0x1da   :  { %v245_v29 = vadd.f32 %v515_v28, %v465_v27  ;;  %v239_v30 = vpop.f32.mrb[1].mxu1 }
 0x1db   :  { %v240_v31 = vadd.f32 %v465_v27, %v239_v30 }
 0x1dc   :  { %v249_v33 = vmax.f32 %v245_v29, 0.0 }
 0x1dd   :  { %v248_v32 = vmax.f32 %v240_v31, 0.0 }
 0x1df   :  { %524 = vmatprep.mubr.msk.f32.mxu0 %vm166_vm1, %v248_v32 }
 0x1e0   :  { %525 = vmatmul.mubr.msk.f32.vlgmr.msra.gmra.mrb[2].mxu0 %vm166_vm1, %v249_v33 }
 0x2b3   :  { %v526_v38 = vpop.f32.mrb[2].mxu0 }
 0x2b4   :  { %v339_v39 = vadd.f32 %v526_v38, %v468_v37  ;;  %v333_v40 = vpop.f32.mrb[3].mxu0 }
 0x2b5   :  { %v334_v41 = vadd.f32 %v468_v37, %v333_v40 }
 0x2b6   :  { %v343_v43 = vmax.f32 %v339_v39, 0.0 }
 0x2b7   :  { %v342_v42 = vmax.f32 %v334_v41, 0.0 }
 0x2b9   :  { %535 = vmatprep.mubr.msk.f32.mxu1 %vm166_vm1, %v342_v42 }
 0x2ba   :  { %536 = vmatmul.mubr.msk.f32.vlgmr.msra.gmra.mrb[2].mxu1 %vm166_vm1, %v343_v43 }
 0x38d   :  { %v537_v45 = vpop.f32.mrb[2].mxu1 }
 0x38e   :  { %v433_v46 = vadd.f32 %v537_v45, %v471_v44  ;;  %v427_v47 = vpop.f32.mrb[3].mxu1 }
 0x38f   :  { %v428_v48 = vadd.f32 %v471_v44, %v427_v47 }
 0x390   :  { %v475_v49 = vmul.f32 -1.442695, %v433_v46 }
 0x391   :  { %v474_v50 = vmul.f32 -1.442695, %v428_v48 }
 0x392   :  { %570 = vpow2.f32 %v475_v49 }
 0x393   :  { %572 = vpow2.f32 %v474_v50 }
 0x39c   :  { %v571_v51 = vpop.eup %570 }
 0x39d   :  { %v573_v52 = vpop.eup %572  ;;  %v446_v53 = vadd.f32 1.0, %v571_v51 }
 0x39e   :  { %v445_v54 = vadd.f32 1.0, %v573_v52 }
 0x39f   :  { %574 = vrcp.f32 %v446_v53 }
 0x3a0   :  { %576 = vrcp.f32 %v445_v54 }
 0x3a9   :  { %v575_v57 = vpop.eup %574 }
 0x3aa   :  { %v577_v58 = vpop.eup %576  ;;  %v452_v59 = vsel %vm438_vm2, %v575_v57, %v433_v46 }
 0x3ab   :  { %455 = vst.msk [vmem:[%s767_s9 + $0x8] sm:$0xff] %vm453_vm3, %v452_v59  ;;  %v451_v60 = vsel %vm438_vm2, %v577_v58, %v428_v48 }
 0x3ac   :  { %454 = vst.msk [vmem:[%s767_s9] sm:$0xff] %vm453_vm3, %v451_v60 }
 0x3ad   :  { %460 = vsyncpa [#allocation3], 1 }
 0x3ae   :  { %461 = vsyncpa [#allocation5], 1 }

</bundles_post_ra>
